<compile_context>
chip_gen: v6e
topology: v6e:2x2x1
jax: 0.10.0
libtpu: 0.0.40
codegen_flags: <defaults>
</compile_context>

<pallas_src>
import jax
import jax.numpy as jnp
from jax.experimental import pallas as pl
from jax.experimental.pallas import tpu as pltpu


def _head_kernel(x_ref, w1_ref, b1_ref, w2_ref, b2_ref, o_ref):
    # x_ref : [TB, H]  features tile, mxu_dtype (already cast in the wrapper)
    # w1_ref: [H,  H]  dense weight (in, out), mxu_dtype
    # b1_ref: [1,  H]  dense bias, f32
    # w2_ref: [H,  L]  out_proj weight (in, out), mxu_dtype
    # b2_ref: [1,  L]  out_proj bias, f32
    # o_ref : [TB, L]  logits tile
    h = jnp.dot(x_ref[...], w1_ref[...], preferred_element_type=jnp.float32)
    h = jnp.tanh(h + b1_ref[...])          # f32 VPU/EUP path (v5e-safe)
    y = jnp.dot(h.astype(w2_ref.dtype), w2_ref[...],
                preferred_element_type=jnp.float32)
    o_ref[...] = (y + b2_ref[...]).astype(o_ref.dtype)


def _round_up(x, m):
    return ((x + m - 1) // m) * m


def _pick_tb(B):
    """Batch-tile heuristic: big tiles amortize per-step overhead, but keep the
    batch grid >= 2 tiles when possible so megacore ("parallel") has work for
    both v7x TensorCores."""
    b8 = _round_up(B, 8)
    tb = min(1024, _round_up(pl.cdiv(b8, 2), 8))
    return max(tb, 8)


def model_head_pallas(features, w1, b1, w2, b2, *, tb=None,
                      mxu_dtype=jnp.bfloat16, out_dtype=None):
    """Pallas path. features: [B, H]; w1: [H, H]; b1: [H]; w2: [H, L]; b2: [L]."""
    B, H = features.shape
    L = w2.shape[1]
    assert w1.shape == (H, H) and w2.shape[0] == H
    assert b1.shape == (H,) and b2.shape == (L,)
    out_dtype = features.dtype if out_dtype is None else out_dtype

    if tb is None:
        tb = _pick_tb(B)
    if tb % 8 != 0:
        raise ValueError("tb must be a multiple of 8 (f32 sublane)")
    Bp = _round_up(B, tb)

    # Batch pad (only padding left); fuse the mxu_dtype cast into it so the
    # feature HBM stream is already narrow (halves bytes for bf16).
    x_p = features
    if Bp != B:
        x_p = jnp.pad(x_p, ((0, Bp - B), (0, 0)))
    x_p = x_p.astype(mxu_dtype)
    w1_c = w1.astype(mxu_dtype)
    w2_c = w2.astype(mxu_dtype)
    b1_r = b1.reshape(1, H).astype(jnp.float32)
    b2_r = b2.reshape(1, L).astype(jnp.float32)

    resident = pl.Buffered(1)   # constant-index operands: single-buffer in VMEM

    itemsize = jnp.dtype(mxu_dtype).itemsize
    bytes_accessed = (Bp * H * itemsize                 # features stream
                      + H * H * itemsize + H * 4        # dense w + b
                      + H * L * itemsize + L * 4        # out_proj w + b
                      + Bp * L * jnp.dtype(out_dtype).itemsize)  # logits writeback
    cost = pl.CostEstimate(flops=2 * Bp * H * H + 2 * Bp * H * L,
                           transcendentals=Bp * H,
                           bytes_accessed=bytes_accessed)

    out = pl.pallas_call(
        _head_kernel,
        out_shape=jax.ShapeDtypeStruct((Bp, L), out_dtype),
        grid=(Bp // tb,),
        in_specs=[
            pl.BlockSpec((tb, H), lambda i: (i, 0)),                          # x (pipelined)
            pl.BlockSpec((H, H), lambda i: (0, 0), pipeline_mode=resident),   # dense W
            pl.BlockSpec((1, H), lambda i: (0, 0), pipeline_mode=resident),   # dense b
            pl.BlockSpec((H, L), lambda i: (0, 0), pipeline_mode=resident),   # out_proj W
            pl.BlockSpec((1, L), lambda i: (0, 0), pipeline_mode=resident),   # out_proj b
        ],
        out_specs=pl.BlockSpec((tb, L), lambda i: (i, 0)),                    # unpadded logits
        compiler_params=pltpu.CompilerParams(
            dimension_semantics=("parallel",)),
        cost_estimate=cost,
    )(x_p, w1_c, b1_r, w2_c, b2_r)

    return out[:B] if Bp != B else out


def model_head(features, w1, b1, w2, b2, *, tb=None, mxu_dtype=jnp.bfloat16,
               out_dtype=None, force_pallas=False):
    """ModelHead forward (inference): tanh(x @ w1 + b1) @ w2 + b2.

    mxu_dtype=jnp.bfloat16 is the production fast path; pass jnp.float32 for
    exact parity with the f32 torch reference.  Tiny problems fall back to a
    fused XLA expression (below the pallas_call launch floor) unless
    force_pallas=True.
    """
    B, H = features.shape
    if not force_pallas and B * H < (1 << 17):
        h = jnp.tanh(jnp.dot(features.astype(mxu_dtype), w1.astype(mxu_dtype),
                             preferred_element_type=jnp.float32) + b1)
        y = jnp.dot(h.astype(mxu_dtype), w2.astype(mxu_dtype),
                    preferred_element_type=jnp.float32) + b2
        return y.astype(features.dtype if out_dtype is None else out_dtype)
    return model_head_pallas(features, w1, b1, w2, b2, tb=tb,
                             mxu_dtype=mxu_dtype, out_dtype=out_dtype)


def model_head_ref(features, w1, b1, w2, b2):
    h = jnp.tanh(features @ w1 + b1)
    return h @ w2 + b2


if __name__ == "__main__":
    # Small shapes consistent with the module: hidden_size=32, num_labels=8, batch=8.
    B, H, L = 8, 32, 8
    key = jax.random.PRNGKey(0)
    kx, kw1, kb1, kw2, kb2 = jax.random.split(key, 5)

    features = jax.random.normal(kx, (B, H), dtype=jnp.float32)
    # Deterministic synthetic parameters (mimics nn.Linear uniform scale).
    w1 = jax.random.uniform(kw1, (H, H), jnp.float32, -1.0, 1.0) / jnp.sqrt(H)
    b1 = jax.random.uniform(kb1, (H,), jnp.float32, -1.0, 1.0) / jnp.sqrt(H)
    w2 = jax.random.uniform(kw2, (H, L), jnp.float32, -1.0, 1.0) / jnp.sqrt(H)
    b2 = jax.random.uniform(kb2, (L,), jnp.float32, -1.0, 1.0) / jnp.sqrt(H)

    ref = model_head_ref(features, w1, b1, w2, b2)

    # 1) Pallas path, f32 MXU operands: matches the f32 reference tightly.
    out_f32 = jax.block_until_ready(
        model_head(features, w1, b1, w2, b2, mxu_dtype=jnp.float32,
                   force_pallas=True))
    assert out_f32.shape == (B, L)
    assert jnp.allclose(out_f32, ref, atol=1e-5, rtol=1e-5), "f32 path mismatch"

    # 2) Pallas path, bf16 MXU operands (production default): looser tolerance.
    out_bf16 = jax.block_until_ready(
        model_head(features, w1, b1, w2, b2, force_pallas=True))
    assert out_bf16.shape == (B, L)
    assert jnp.allclose(out_bf16, ref, atol=3e-2, rtol=3e-2), "bf16 path mismatch"

    # 3) Multi-tile grid + batch padding: B=40 with tb=16 -> padded to 48, grid=(3,).
    B2 = 40
    feats2 = jax.random.normal(jax.random.PRNGKey(1), (B2, H), dtype=jnp.float32)
    out2 = jax.block_until_ready(
        model_head(feats2, w1, b1, w2, b2, tb=16, mxu_dtype=jnp.float32,
                   force_pallas=True))
    ref2 = model_head_ref(feats2, w1, b1, w2, b2)
    assert out2.shape == (B2, L)
    assert jnp.allclose(out2, ref2, atol=1e-5, rtol=1e-5), "multi-tile mismatch"

    # 4) Default tb heuristic splits the batch into >=2 tiles (megacore-friendly):
    #    B=64 -> tb=32, grid=(2,).
    B3 = 64
    feats3 = jax.random.normal(jax.random.PRNGKey(2), (B3, H), dtype=jnp.float32)
    out3 = jax.block_until_ready(
        model_head(feats3, w1, b1, w2, b2, mxu_dtype=jnp.float32,
                   force_pallas=True))
    ref3 = model_head_ref(feats3, w1, b1, w2, b2)
    assert out3.shape == (B3, L)
    assert jnp.allclose(out3, ref3, atol=1e-5, rtol=1e-5), "default-tb mismatch"

    # 5) Tiny-shape dispatcher path (fused XLA, no Pallas launch) is also correct.
    out_small = jax.block_until_ready(
        model_head(features, w1, b1, w2, b2, mxu_dtype=jnp.float32))
    assert jnp.allclose(out_small, ref, atol=1e-5, rtol=1e-5), "XLA fallback mismatch"

    print("KERNEL_OK")
</pallas_src>

<mosaic_0001>
module attributes {stable_mosaic.version = 11 : i64} {
  func.func @_head_kernel(%arg0: i32, %arg1: memref<8x32xf32, #tpu.memory_space<vmem>>, %arg2: memref<32x32xf32, #tpu.memory_space<vmem>>, %arg3: memref<1x32xf32, #tpu.memory_space<vmem>>, %arg4: memref<32x8xf32, #tpu.memory_space<vmem>>, %arg5: memref<1x8xf32, #tpu.memory_space<vmem>>, %arg6: memref<8x8xf32, #tpu.memory_space<vmem>>) attributes {dimension_semantics = [#tpu.dimension_semantics<parallel>], iteration_bounds = array<i64: 1>, scalar_prefetch = 0 : i64, scratch_operands = 0 : i64, tpu.core_type = #tpu.core_type<tc>, window_params = [{transform_indices = @transform_0, window_bounds = array<i64: 8, 32>}, {pipeline_mode = #tpu.pipeline_mode<synchronous>, transform_indices = @transform_1, window_bounds = array<i64: 32, 32>}, {pipeline_mode = #tpu.pipeline_mode<synchronous>, transform_indices = @transform_2, window_bounds = array<i64: 1, 32>}, {pipeline_mode = #tpu.pipeline_mode<synchronous>, transform_indices = @transform_3, window_bounds = array<i64: 32, 8>}, {pipeline_mode = #tpu.pipeline_mode<synchronous>, transform_indices = @transform_4, window_bounds = array<i64: 1, 8>}, {transform_indices = @transform_5, window_bounds = array<i64: 8, 8>}]} {
    %c0 = arith.constant 0 : index
    %c0_0 = arith.constant 0 : index
    %0 = vector.load %arg1[%c0, %c0_0] : memref<8x32xf32, #tpu.memory_space<vmem>>, vector<8x32xf32>
    %c0_1 = arith.constant 0 : index
    %c0_2 = arith.constant 0 : index
    %1 = vector.load %arg2[%c0_1, %c0_2] : memref<32x32xf32, #tpu.memory_space<vmem>>, vector<32x32xf32>
    %cst = arith.constant dense<0.000000e+00> : vector<8x32xf32>
    %2 = tpu.matmul %0, %1, %cst {dimension_numbers = #tpu.dot_dimension_numbers<[1], [0], [0], [1], [0, 0, 1, 1], [], []>} : vector<8x32xf32>, vector<32x32xf32>, vector<8x32xf32> -> vector<8x32xf32>
    %c0_3 = arith.constant 0 : index
    %c0_4 = arith.constant 0 : index
    %3 = vector.load %arg3[%c0_3, %c0_4] : memref<1x32xf32, #tpu.memory_space<vmem>>, vector<1x32xf32>
    %4 = vector.broadcast %3 : vector<1x32xf32> to vector<8x32xf32>
    %5 = arith.addf %2, %4 : vector<8x32xf32>
    %6 = math.tanh %5 : vector<8x32xf32>
    %c0_5 = arith.constant 0 : index
    %c0_6 = arith.constant 0 : index
    %7 = vector.load %arg4[%c0_5, %c0_6] : memref<32x8xf32, #tpu.memory_space<vmem>>, vector<32x8xf32>
    %cst_7 = arith.constant dense<0.000000e+00> : vector<8x8xf32>
    %8 = tpu.matmul %6, %7, %cst_7 {dimension_numbers = #tpu.dot_dimension_numbers<[1], [0], [0], [1], [0, 0, 1, 1], [], []>} : vector<8x32xf32>, vector<32x8xf32>, vector<8x8xf32> -> vector<8x8xf32>
    %c0_8 = arith.constant 0 : index
    %c0_9 = arith.constant 0 : index
    %9 = vector.load %arg5[%c0_8, %c0_9] : memref<1x8xf32, #tpu.memory_space<vmem>>, vector<1x8xf32>
    %10 = vector.broadcast %9 : vector<1x8xf32> to vector<8x8xf32>
    %11 = arith.addf %8, %10 : vector<8x8xf32>
    %c0_10 = arith.constant 0 : index
    %c0_11 = arith.constant 0 : index
    %12 = vector.load %arg6[%c0_10, %c0_11] : memref<8x8xf32, #tpu.memory_space<vmem>>, vector<8x8xf32>
    tpu.vector_store %arg6[%c0_10, %c0_11], %11 {strides = array<i32>} : memref<8x8xf32, #tpu.memory_space<vmem>>, vector<8x8xf32>,
    return
  }
  func.func @transform_0(%arg0: i32) -> (i32, i32) {
    %c0_i32 = arith.constant 0 : i32
    %c0_i32_0 = arith.constant 0 : i32
    return %arg0, %c0_i32 : i32, i32
  }
  func.func @transform_1(%arg0: i32) -> (i32, i32) {
    %c0_i32 = arith.constant 0 : i32
    %c0_i32_0 = arith.constant 0 : i32
    %c0_i32_1 = arith.constant 0 : i32
    return %c0_i32, %c0_i32_0 : i32, i32
  }
  func.func @transform_2(%arg0: i32) -> (i32, i32) {
    %c0_i32 = arith.constant 0 : i32
    %c0_i32_0 = arith.constant 0 : i32
    %c0_i32_1 = arith.constant 0 : i32
    return %c0_i32, %c0_i32_0 : i32, i32
  }
  func.func @transform_3(%arg0: i32) -> (i32, i32) {
    %c0_i32 = arith.constant 0 : i32
    %c0_i32_0 = arith.constant 0 : i32
    %c0_i32_1 = arith.constant 0 : i32
    return %c0_i32, %c0_i32_0 : i32, i32
  }
  func.func @transform_4(%arg0: i32) -> (i32, i32) {
    %c0_i32 = arith.constant 0 : i32
    %c0_i32_0 = arith.constant 0 : i32
    %c0_i32_1 = arith.constant 0 : i32
    return %c0_i32, %c0_i32_0 : i32, i32
  }
  func.func @transform_5(%arg0: i32) -> (i32, i32) {
    %c0_i32 = arith.constant 0 : i32
    %c0_i32_0 = arith.constant 0 : i32
    return %arg0, %c0_i32 : i32, i32
  }
}

</mosaic_0001>

<bundles_post_ra>
// kernel: tpu_custom_call.1
= control target key start
LH: loop header
LB: loop body
LE: loop exit
PB: predicated region body
PF: predicated region fallthrough
CT: control target
= control target key end

     0   :  { %v271_v1 = vmov 0.0   ;;  %vm272_vm0 = vmmov 0   ;;  %s342_s0 = inlined_call_operand.vmem [shape: f32[8,32], index: 0, kind: input, shape index: {}]   ;;  %s343_s1 = inlined_call_operand.vmem [shape: f32[32,32], index: 1, kind: input, shape index: {}]   ;;  %s344_s2 = inlined_call_operand.vmem [shape: f32[1,32], index: 2, kind: input, shape index: {}]   ;;  %s345_s3 = inlined_call_operand.vmem [shape: f32[32,8], index: 3, kind: input, shape index: {}]   ;;  %s346_s4 = inlined_call_operand.vmem [shape: f32[1,8], index: 4, kind: input, shape index: {}]   ;;  %s347_s5 = inlined_call_operand.hbm [shape: f32[8,8], index: 5, kind: output, shape index: {}]  }
   0x1   :  { %v25_v0 = vld [vmem:[%s343_s1 + $0x18] sm:$0xff]  ;;  %222 = vmatprep.subr.mxu0 %v271_v1  ;;  %v24_v2 = vld [vmem:[%s343_s1 + $0x10] sm:$0xff]  ;;  %230 = vmatprep.mubr.msk.f32.mxu0 %vm272_vm0, %v271_v1 }
   0x2   :  { %223 = vmatpush3.msra.mxu0 %v25_v0  ;;  %233 = vmatprep.subr.mxu1 %v271_v1 }
   0x3   :  { %10 = vsyncpa [#allocation3], 0  ;;  %224 = vmatprep.subr.mxu0 %v271_v1  ;;  %v23_v3 = vld [vmem:[%s343_s1 + $0x8] sm:$0xff]  ;;  %241 = vmatprep.mubr.msk.f32.mxu1 %vm272_vm0, %v271_v1  ;;  %v22_v4 = vld [vmem:[%s343_s1] sm:$0xff]  ;;  %vm33_vm1 = vcmask 261120   ;;  %s273_s13 = smov [#allocation2]  }
   0x4   :  { %225 = vmatpush3.msra.mxu0 %v24_v2  ;;  %v21_v5 = vld [vmem:[%s342_s0] sm:$0xff]  ;;  %v111_v6 = vld [vmem:[%s345_s3 + $0x18] sm:$0xff]  ;;  %v110_v7 = vld [vmem:[%s345_s3 + $0x10] sm:$0xff]  ;;  %vm192_vm2 = vcmask 64512  }
   0x5   :  { %226 = vmatprep.subr.mxu0 %v271_v1  ;;  %234 = vmatpush3.msra.mxu1 %v111_v6  ;;  %v109_v8 = vld [vmem:[%s345_s3 + $0x8] sm:$0xff]  ;;  %v108_v9 = vld [vmem:[%s345_s3] sm:$0xff]  ;;  %s200_s3 = sshll.u32 %s273_s13, 4  ;;  %s201_s3 = int_to_ptr.vmem [resolvable:$true] %s200_s3 }
   0x6   :  { %227 = vmatpush3.msra.mxu0 %v23_v3  ;;  %235 = vmatprep.subr.mxu1 %v271_v1  ;;  %v208_v10 = vld [vmem:[%s344_s2] ss:$0 sm:$0xff]  ;;  %s249_s2 = scalar_lea.vmem %s201_s3, 128  ;;  %p254_p1 = scmp.lt.s32.totalorder %s201_s3, %s201_s3 }
   0x7   :  { %228 = vmatprep.subr.mxu0 %v271_v1  ;;  %236 = vmatpush3.msra.mxu1 %v110_v7  ;;  %v210_v15 = vld [vmem:[%s346_s4] ss:$0 sm:$0xff]  ;;  %p250_p0 = scmp.ne.s32.totalorder %s201_s3, %s249_s2  ;;  %p255_p2 = scmp.lt.s32.totalorder %s249_s2, %s249_s2 }
   0x8   :  { %229 = vmatpush3.msra.mxu0 %v22_v4  ;;  %237 = vmatprep.subr.mxu1 %v271_v1 }
   0x9   :  { %231 = vmatmul.mubr.msk.f32.vlgmr.msra.gmra.mxu0 %vm33_vm1, %v21_v5  ;;  %238 = vmatpush3.msra.mxu1 %v109_v8  ;;  %p256_p3 = por %p255_p2, %p254_p1 }
   0xa   :  { %239 = vmatprep.subr.mxu1 %v271_v1 }
   0xb   :  { %240 = vmatpush3.msra.mxu1 %v108_v9  ;;  %p257_p4 = pnand %p256_p3, %p250_p0 }
  0xc9   :  { %v103_v11 = vpop.f32.mrf.mxu0 }
  0xca   :  { %v104_v12 = vadd.f32 %v208_v10, %v103_v11 }
  0xcb   :  { %v232_v13 = vpop.f32.mrf.mxu0 }
  0xcc   :  { %247 = vtanh.f32 %v104_v12 }
  0xd9   :  { %v248_v14 = vpop.eup %247 }
  0xda   :  { %242 = vmatmul.mubr.msk.f32.vlgmr.msra.gmra.mxu1 %vm33_vm1, %v248_v14 }
 0x19a   :  { %v188_v16 = vpop.f32.mrf.mxu1 }
 0x19b   :  { %v189_v17 = vadd.f32 %v210_v15, %v188_v16 }
 0x19c   :  { %v243_v18 = vpop.f32.mrf.mxu1 }
 0x19d   :  { %193 = vst.msk [vmem:[#allocation2] sm:$0xff] %vm192_vm2, %v189_v17 }
 0x19e   :  { %260 = shalt.err (!%p257_p4)
}
 0x19f   :  { %203 = dma.vmem_to_hbm [thread:$0]  %s201_s3, 128, %s347_s5, [#allocation3]  }
 0x1a0   :  { %269 = dma.done.wait [#allocation3], 128  }
 0x1a1   :  { %270 = vsyncadd [#allocation3], 4294967168 }
 0x1a2   :  { %207 = vsyncpa [#allocation3], 1 }

</bundles_post_ra>
